<compile_context>
chip_gen: v6e
topology: v6e:2x2x1
jax: 0.10.0
libtpu: 0.0.40
codegen_flags: <defaults>
</compile_context>

<pallas_src>
import functools
import math

import jax
import jax.numpy as jnp
from jax.experimental import pallas as pl
from jax.experimental.pallas import tpu as pltpu


# ----------------------------- Pallas kernels ------------------------------

def _apply_act(z, act):
    if act == "relu":
        return jnp.maximum(z, 0.0)
    if act == "glu":
        h = z.shape[-1] // 2
        return z[:, :h] * jax.nn.sigmoid(z[:, h:])
    return z


def _mm_kernel(a_ref, w_ref, b_ref, o_ref, *, act):
    """o = act(a @ w + b).  MXU operands in bf16, f32 accumulate/elementwise."""
    a = a_ref[...].astype(jnp.bfloat16)
    w = w_ref[...].astype(jnp.bfloat16)
    z = jnp.dot(a, w, preferred_element_type=jnp.float32) + b_ref[...]
    o_ref[...] = _apply_act(z, act)


def _mm_res_kernel(a_ref, r_ref, w_ref, b_ref, o_ref, *, act):
    """o = act((a + r) @ w + b)  (skip-connection fused into the matmul)."""
    a = (a_ref[...] + r_ref[...]).astype(jnp.bfloat16)
    w = w_ref[...].astype(jnp.bfloat16)
    z = jnp.dot(a, w, preferred_element_type=jnp.float32) + b_ref[...]
    o_ref[...] = _apply_act(z, act)


def _mm_add_ln_kernel(a_ref, w_ref, b_ref, r_ref, g_ref, be_ref, o_ref):
    """o = LayerNorm(a @ w + b + r), eps=1e-6 (matches nn.LayerNorm(eps=1e-6))."""
    a = a_ref[...].astype(jnp.bfloat16)
    w = w_ref[...].astype(jnp.bfloat16)
    z = jnp.dot(a, w, preferred_element_type=jnp.float32) + b_ref[...] + r_ref[...]
    mean = jnp.mean(z, axis=-1, keepdims=True)
    var = jnp.mean((z - mean) ** 2, axis=-1, keepdims=True)
    o_ref[...] = (z - mean) * jax.lax.rsqrt(var + 1e-6) * g_ref[...] + be_ref[...]


def _ln_kernel(x_ref, g_ref, b_ref, o_ref):
    z = x_ref[...]
    mean = jnp.mean(z, axis=-1, keepdims=True)
    var = jnp.mean((z - mean) ** 2, axis=-1, keepdims=True)
    o_ref[...] = (z - mean) * jax.lax.rsqrt(var + 1e-6) * g_ref[...] + b_ref[...]


def _sum_bias_act_kernel(*refs, act):
    """o = act(x0 + x1 + ... + b) — overlap-add tail fused with bias/ReLU."""
    x_refs = refs[:-2]
    b_ref, o_ref = refs[-2], refs[-1]
    z = x_refs[0][...]
    for r in x_refs[1:]:
        z = z + r[...]
    z = z + b_ref[...]
    o_ref[...] = _apply_act(z, act)


def _bias_act_kernel(x_ref, b_ref, o_ref, *, act):
    o_ref[...] = _apply_act(x_ref[...] + b_ref[...], act)


def _attn_kernel(q_ref, k_ref, v_ref, o_ref, *, scale):
    """Causal attention for one batch, all heads in one instance.
    TODO(synk): for long sequences, switch to flash-style KV tiling so the
    (nh, S, S) score block stays within v7x/v5e scoped-VMEM limits."""
    q = (q_ref[0] * scale).astype(jnp.bfloat16)      # (nh, S, dk)
    k = k_ref[0].astype(jnp.bfloat16)
    v = v_ref[0].astype(jnp.bfloat16)
    s = jnp.einsum("hqd,hkd->hqk", q, k, preferred_element_type=jnp.float32)
    S = s.shape[-1]
    row = jax.lax.broadcasted_iota(jnp.int32, (1, S, S), 1)
    col = jax.lax.broadcasted_iota(jnp.int32, (1, S, S), 2)
    s = jnp.where(col <= row, s, -1e9)               # masked_fill(mask==0, -1e9)
    m = jnp.max(s, axis=-1, keepdims=True)
    p = jnp.exp(s - m)
    p = p / jnp.sum(p, axis=-1, keepdims=True)
    o = jnp.einsum("hqk,hkd->hqd", p.astype(jnp.bfloat16), v,
                   preferred_element_type=jnp.float32)
    o_ref[0] = o


# --------------------------- Pallas call wrappers ---------------------------

_TM = 256   # row tile (sublane multiple of 8); full extent used when M <= _TM
_CP = pltpu.CompilerParams(dimension_semantics=("parallel",))


def _row_grid(m):
    """Pick (row_tile, grid) without any HBM pad/slice copies."""
    if m <= _TM:
        return m, 1                       # single full-extent block
    return _TM, pl.cdiv(m, _TM)           # ragged last block handled by Pallas


def mm_bias_act(a, w, b, act=None):
    m, kd = a.shape
    n = w.shape[1]
    n_out = n // 2 if act == "glu" else n
    tm, gm = _row_grid(m)
    return pl.pallas_call(
        functools.partial(_mm_kernel, act=act),
        out_shape=jax.ShapeDtypeStruct((m, n_out), jnp.float32),
        grid=(gm,),
        in_specs=[pl.BlockSpec((tm, kd), lambda i: (i, 0)),
                  pl.BlockSpec((kd, n), lambda i: (0, 0)),
                  pl.BlockSpec((1, n), lambda i: (0, 0))],
        out_specs=pl.BlockSpec((tm, n_out), lambda i: (i, 0)),
        compiler_params=_CP,
    )(a, w, b.reshape(1, n))


def mm_res_bias_act(a, r, w, b, act=None):
    m, kd = a.shape
    n = w.shape[1]
    n_out = n // 2 if act == "glu" else n
    tm, gm = _row_grid(m)
    return pl.pallas_call(
        functools.partial(_mm_res_kernel, act=act),
        out_shape=jax.ShapeDtypeStruct((m, n_out), jnp.float32),
        grid=(gm,),
        in_specs=[pl.BlockSpec((tm, kd), lambda i: (i, 0)),
                  pl.BlockSpec((tm, kd), lambda i: (i, 0)),
                  pl.BlockSpec((kd, n), lambda i: (0, 0)),
                  pl.BlockSpec((1, n), lambda i: (0, 0))],
        out_specs=pl.BlockSpec((tm, n_out), lambda i: (i, 0)),
        compiler_params=_CP,
    )(a, r, w, b.reshape(1, n))


def mm_add_ln(a, w, b, r, gamma, beta):
    m, kd = a.shape
    n = w.shape[1]
    tm, gm = _row_grid(m)
    return pl.pallas_call(
        _mm_add_ln_kernel,
        out_shape=jax.ShapeDtypeStruct((m, n), jnp.float32),
        grid=(gm,),
        in_specs=[pl.BlockSpec((tm, kd), lambda i: (i, 0)),
                  pl.BlockSpec((kd, n), lambda i: (0, 0)),
                  pl.BlockSpec((1, n), lambda i: (0, 0)),
                  pl.BlockSpec((tm, n), lambda i: (i, 0)),
                  pl.BlockSpec((1, n), lambda i: (0, 0)),
                  pl.BlockSpec((1, n), lambda i: (0, 0))],
        out_specs=pl.BlockSpec((tm, n), lambda i: (i, 0)),
        compiler_params=_CP,
    )(a, w, b.reshape(1, n), r, gamma.reshape(1, n), beta.reshape(1, n))


def layernorm(x, gamma, beta):
    m, d = x.shape
    tm, gm = _row_grid(m)
    return pl.pallas_call(
        _ln_kernel,
        out_shape=jax.ShapeDtypeStruct((m, d), jnp.float32),
        grid=(gm,),
        in_specs=[pl.BlockSpec((tm, d), lambda i: (i, 0)),
                  pl.BlockSpec((1, d), lambda i: (0, 0)),
                  pl.BlockSpec((1, d), lambda i: (0, 0))],
        out_specs=pl.BlockSpec((tm, d), lambda i: (i, 0)),
        compiler_params=_CP,
    )(x, gamma.reshape(1, d), beta.reshape(1, d))


def sum_bias_act(parts, b, act=None):
    m, n = parts[0].shape
    tm, gm = _row_grid(m)
    in_specs = [pl.BlockSpec((tm, n), lambda i: (i, 0)) for _ in parts]
    in_specs.append(pl.BlockSpec((1, n), lambda i: (0, 0)))
    return pl.pallas_call(
        functools.partial(_sum_bias_act_kernel, act=act),
        out_shape=jax.ShapeDtypeStruct((m, n), jnp.float32),
        grid=(gm,),
        in_specs=in_specs,
        out_specs=pl.BlockSpec((tm, n), lambda i: (i, 0)),
        compiler_params=_CP,
    )(*parts, b.reshape(1, n))


def bias_act(x, b, act=None):
    m, n = x.shape
    tm, gm = _row_grid(m)
    return pl.pallas_call(
        functools.partial(_bias_act_kernel, act=act),
        out_shape=jax.ShapeDtypeStruct((m, n), jnp.float32),
        grid=(gm,),
        in_specs=[pl.BlockSpec((tm, n), lambda i: (i, 0)),
                  pl.BlockSpec((1, n), lambda i: (0, 0))],
        out_specs=pl.BlockSpec((tm, n), lambda i: (i, 0)),
        compiler_params=_CP,
    )(x, b.reshape(1, n))


def attention(qh, kh, vh, dk):
    """qh/kh/vh: (B, n_head, S, dk) — one kernel instance per batch, all heads."""
    B, nh, S, dkk = qh.shape
    spec = pl.BlockSpec((1, nh, S, dkk), lambda i: (i, 0, 0, 0))
    return pl.pallas_call(
        functools.partial(_attn_kernel, scale=1.0 / math.sqrt(dk)),
        out_shape=jax.ShapeDtypeStruct((B, nh, S, dkk), jnp.float32),
        grid=(B,),
        in_specs=[spec, spec, spec],
        out_specs=pl.BlockSpec((1, nh, S, dkk), lambda i: (i, 0, 0, 0)),
        compiler_params=_CP,
    )(qh, kh, vh)


# ------------------------------- Model glue ---------------------------------

def padded_length(L, depth, K, S):
    """CleanUNet's `padding()` length computation."""
    for _ in range(depth):
        L = 1 if L < K else 1 + math.ceil((L - K) / S)
    for _ in range(depth):
        L = (L - 1) * S + K
    return int(L)


def encoder_block(p, x_nlc, K, S):
    """Conv1d(K,S) -> ReLU -> Conv1d(1x1) -> GLU."""
    B, Lin, Cin = x_nlc.shape
    Lout = (Lin - K) // S + 1
    # Patches from K strided slices (no gather): (B, Lout, Cin, K) -> (B*Lout, Cin*K)
    taps = [x_nlc[:, k: k + (Lout - 1) * S + 1: S, :] for k in range(K)]
    patches = jnp.stack(taps, axis=-1).reshape(B * Lout, Cin * K)
    H = p["b1"].shape[0]
    h = mm_bias_act(patches, p["w1"], p["b1"], act="relu")       # (B*Lout, H)
    h = mm_bias_act(h, p["w2"], p["b2"], act="glu")              # (B*Lout, H)
    return h.reshape(B, Lout, H)


def decoder_block(p, x_nlc, skip_nlc, K, S):
    """(x+skip) -> Conv1d(1x1) -> GLU -> ConvTranspose1d(K,S) [-> ReLU]."""
    B, Lin, Cin = x_nlc.shape
    # Skip-connection add fused into the 1x1-GLU matmul kernel.
    h = mm_res_bias_act(x_nlc.reshape(B * Lin, Cin), skip_nlc.reshape(B * Lin, Cin),
                        p["w1"], p["b1"], act="glu")
    Cout = p["bt"].shape[0]
    cols = mm_bias_act(h, p["wt"], jnp.zeros((K * Cout,), jnp.float32), act=None)
    cols = cols.reshape(B, Lin, K, Cout)
    Lout = (Lin - 1) * S + K
    act = "relu" if p["relu"] else None
    if K % S == 0:
        # Dense overlap-add: split taps into K//S contiguous groups, each group
        # lands contiguously in the output shifted by g*S; sum fused with
        # bias/ReLU in a single Pallas kernel (no scatter-add loop).
        m_grp = K // S
        parts = []
        for g in range(m_grp):
            part = cols[:, :, g * S:(g + 1) * S, :].reshape(B, Lin * S, Cout)
            part = jnp.pad(part, ((0, 0), (g * S, Lout - Lin * S - g * S), (0, 0)))
            parts.append(part.reshape(B * Lout, Cout))
        y = sum_bias_act(parts, p["bt"], act)
    else:
        # TODO(synk): rare K % S != 0 case falls back to strided scatter-add.
        y = jnp.zeros((B, Lout, Cout), jnp.float32)
        for k in range(K):
            y = y.at[:, k: k + (Lin - 1) * S + 1: S, :].add(cols[:, :, k, :])
        y = bias_act(y.reshape(B * Lout, Cout), p["bt"], act)
    return y.reshape(B, Lout, Cout)


def transformer_layer(lp, x, n_head):
    B, S, Dm = x.shape
    dk = Dm // n_head
    xf = x.reshape(B * S, Dm)
    # Fused Q/K/V projection: one matmul with (Dm, 3*Dm) weight.
    qkv = mm_bias_act(xf, lp["wqkv"], lp["bqkv"], None)                 # (B*S, 3*Dm)
    qkv = qkv.reshape(B, S, 3, n_head, dk).transpose(2, 0, 3, 1, 4)     # (3,B,nh,S,dk)
    oh = attention(qkv[0], qkv[1], qkv[2], dk)                          # (B,nh,S,dk)
    o = oh.transpose(0, 2, 1, 3).reshape(B * S, n_head * dk)
    # Output projection fused with residual add + post-LN.
    x1 = mm_add_ln(o, lp["wo"], lp["bo"], xf, lp["ln1_g"], lp["ln1_b"])
    # FFN: w1+ReLU, then w2 fused with residual add + post-LN.
    h = mm_bias_act(x1, lp["w1"], lp["b1"], "relu")
    x2 = mm_add_ln(h, lp["w2"], lp["b2"], x1, lp["ln2_g"], lp["ln2_b"])
    return x2.reshape(B, S, Dm)


def transformer_encoder(tp, x, n_head):
    B, S, Dm = x.shape
    # dropout=0, n_position=0 (identity positional enc); LayerNorm before the stack
    x = layernorm(x.reshape(B * S, Dm), tp["ln0_g"], tp["ln0_b"]).reshape(B, S, Dm)
    for lyr in tp["layers"]:
        x = transformer_layer(lyr, x, n_head)
    return x


def clean_unet_forward(params, cfg, noisy_audio):
    K, S, depth = cfg["kernel_size"], cfg["stride"], cfg["encoder_n_layers"]
    if noisy_audio.ndim == 2:
        noisy_audio = noisy_audio[:, None, :]
    B, C, L = noisy_audio.shape
    assert C == 1
    std = jnp.std(noisy_audio, axis=2, keepdims=True, ddof=1) + 1e-3  # torch unbiased std
    x = noisy_audio / std
    Lp = padded_length(L, depth, K, S)
    x = jnp.pad(x, ((0, 0), (0, 0), (0, Lp - L)))
    x = jnp.transpose(x, (0, 2, 1))  # NCL -> NLC

    skips = []
    for p in params["enc"]:
        x = encoder_block(p, x, K, S)
        skips.append(x)
    skips = skips[::-1]

    tp = params["tsfm"]
    Bb, Sb, Cb = x.shape
    h = mm_bias_act(x.reshape(Bb * Sb, Cb), tp["conv1_w"], tp["conv1_b"], None)
    h = h.reshape(Bb, Sb, -1)
    h = transformer_encoder(tp, h, cfg["tsfm_n_head"])
    dm = h.shape[-1]
    x = mm_bias_act(h.reshape(Bb * Sb, dm), tp["conv2_w"], tp["conv2_b"], None)
    x = x.reshape(Bb, Sb, Cb)

    for i, p in enumerate(params["dec"]):
        skip = skips[i][:, : x.shape[1], :]
        x = decoder_block(p, x, skip, K, S)

    x = jnp.transpose(x, (0, 2, 1))  # NLC -> NCL
    return x[:, :, :L] * std


# --------------------------- deterministic init ------------------------------

def init_clean_unet_params(key, cfg):
    keys = iter(jax.random.split(key, 256))

    def w(shape, scale=0.1):
        return jax.random.normal(next(keys), shape, dtype=jnp.float32) * scale

    enc, dec = [], []
    ci = cfg["channels_input"]
    co = cfg["channels_output"]
    H = cfg["channels_H"]
    K = cfg["kernel_size"]
    for i in range(cfg["encoder_n_layers"]):
        enc.append({
            "w1": w((H, ci, K)).reshape(H, ci * K).T,          # Conv1d weight -> (ci*K, H)
            "b1": w((H,), 0.05),
            "w2": w((2 * H, H, 1))[:, :, 0].T,                 # 1x1 conv -> (H, 2H)
            "b2": w((2 * H,), 0.05),
        })
        dec.insert(0, {                                        # torch inserts at front
            "w1": w((2 * H, H, 1))[:, :, 0].T,                 # (H, 2H)
            "b1": w((2 * H,), 0.05),
            "wt": w((H, co, K)).transpose(0, 2, 1).reshape(H, K * co),  # ConvT -> (H, K*co)
            "bt": w((co,), 0.05),
            "relu": i != 0,                                    # first-created block has no ReLU
        })
        ci = H
        co = H
        H = min(2 * H, cfg["max_H"])

    dm, di, nh = cfg["tsfm_d_model"], cfg["tsfm_d_inner"], cfg["tsfm_n_head"]
    dk = dm // nh
    tsfm = {
        "conv1_w": w((dm, co, 1))[:, :, 0].T, "conv1_b": w((dm,), 0.05),
        "conv2_w": w((co, dm, 1))[:, :, 0].T, "conv2_b": w((co,), 0.05),
        "ln0_g": jnp.ones((dm,), jnp.float32), "ln0_b": jnp.zeros((dm,), jnp.float32),
        "layers": [],
    }
    for _ in range(cfg["tsfm_n_layers"]):
        wq = w((nh * dk, dm)).T
        wk = w((nh * dk, dm)).T
        wv = w((nh * dk, dm)).T
        tsfm["layers"].append({
            "wqkv": jnp.concatenate([wq, wk, wv], axis=1),     # (dm, 3*dm) fused QKV
            "bqkv": jnp.zeros((3 * nh * dk,), jnp.float32),
            "wo": w((dm, nh * dk)).T, "bo": jnp.zeros((dm,), jnp.float32),
            "ln1_g": jnp.ones((dm,), jnp.float32), "ln1_b": jnp.zeros((dm,), jnp.float32),
            "w1": w((di, dm)).T, "b1": w((di,), 0.05),
            "w2": w((dm, di)).T, "b2": w((dm,), 0.05),
            "ln2_g": jnp.ones((dm,), jnp.float32), "ln2_b": jnp.zeros((dm,), jnp.float32),
        })
    return {"enc": enc, "dec": dec, "tsfm": tsfm}


# ----------------------------------- main ------------------------------------

if __name__ == "__main__":
    cfg = dict(channels_input=1, channels_output=1, channels_H=8, max_H=32,
               encoder_n_layers=3, kernel_size=4, stride=2,
               tsfm_n_layers=1, tsfm_n_head=2, tsfm_d_model=16, tsfm_d_inner=32)
    key = jax.random.PRNGKey(0)
    pkey, xkey = jax.random.split(key)
    params = init_clean_unet_params(pkey, cfg)
    noisy_audio = jax.random.normal(xkey, (2, 1, 64), dtype=jnp.float32)  # NCL

    out = clean_unet_forward(params, cfg, noisy_audio)
    out = jax.block_until_ready(out)
    assert out.shape == (2, 1, 64), out.shape
    assert bool(jnp.all(jnp.isfinite(out)))
    print("KERNEL_OK")
</pallas_src>

<mosaic_0001>
module attributes {stable_mosaic.version = 11 : i64} {
  func.func @_mm_kernel(%arg0: i32, %arg1: memref<68x4xf32, #tpu.memory_space<vmem>>, %arg2: memref<4x8xf32, #tpu.memory_space<vmem>>, %arg3: memref<1x8xf32, #tpu.memory_space<vmem>>, %arg4: memref<68x8xf32, #tpu.memory_space<vmem>>) attributes {dimension_semantics = [#tpu.dimension_semantics<parallel>], iteration_bounds = array<i64: 1>, scalar_prefetch = 0 : i64, scratch_operands = 0 : i64, tpu.core_type = #tpu.core_type<tc>, window_params = [{transform_indices = @transform_0, window_bounds = array<i64: 68, 4>}, {pipeline_mode = #tpu.pipeline_mode<synchronous>, transform_indices = @transform_1, window_bounds = array<i64: 4, 8>}, {pipeline_mode = #tpu.pipeline_mode<synchronous>, transform_indices = @transform_2, window_bounds = array<i64: 1, 8>}, {transform_indices = @transform_3, window_bounds = array<i64: 68, 8>}]} {
    %c0 = arith.constant 0 : index
    %c0_0 = arith.constant 0 : index
    %0 = vector.load %arg1[%c0, %c0_0] : memref<68x4xf32, #tpu.memory_space<vmem>>, vector<68x4xf32>
    %1 = arith.truncf %0 : vector<68x4xf32> to vector<68x4xbf16>
    %c0_1 = arith.constant 0 : index
    %c0_2 = arith.constant 0 : index
    %2 = vector.load %arg2[%c0_1, %c0_2] : memref<4x8xf32, #tpu.memory_space<vmem>>, vector<4x8xf32>
    %3 = arith.truncf %2 : vector<4x8xf32> to vector<4x8xbf16>
    %cst = arith.constant dense<0.000000e+00> : vector<68x8xf32>
    %4 = tpu.matmul %1, %3, %cst {dimension_numbers = #tpu.dot_dimension_numbers<[1], [0], [0], [1], [0, 0, 1, 1], [], []>} : vector<68x4xbf16>, vector<4x8xbf16>, vector<68x8xf32> -> vector<68x8xf32>
    %c0_3 = arith.constant 0 : index
    %c0_4 = arith.constant 0 : index
    %5 = vector.load %arg3[%c0_3, %c0_4] : memref<1x8xf32, #tpu.memory_space<vmem>>, vector<1x8xf32>
    %6 = vector.broadcast %5 : vector<1x8xf32> to vector<68x8xf32>
    %7 = arith.addf %4, %6 : vector<68x8xf32>
    %cst_5 = arith.constant 0.000000e+00 : f32
    %8 = vector.broadcast %cst_5 : f32 to vector<68x8xf32>
    %9 = arith.maximumf %7, %8 : vector<68x8xf32>
    %c0_6 = arith.constant 0 : index
    %c0_7 = arith.constant 0 : index
    %10 = vector.load %arg4[%c0_6, %c0_7] : memref<68x8xf32, #tpu.memory_space<vmem>>, vector<68x8xf32>
    tpu.vector_store %arg4[%c0_6, %c0_7], %9 {strides = array<i32>} : memref<68x8xf32, #tpu.memory_space<vmem>>, vector<68x8xf32>,
    return
  }
  func.func @transform_0(%arg0: i32) -> (i32, i32) {
    %c0_i32 = arith.constant 0 : i32
    %c0_i32_0 = arith.constant 0 : i32
    return %arg0, %c0_i32 : i32, i32
  }
  func.func @transform_1(%arg0: i32) -> (i32, i32) {
    %c0_i32 = arith.constant 0 : i32
    %c0_i32_0 = arith.constant 0 : i32
    %c0_i32_1 = arith.constant 0 : i32
    return %c0_i32, %c0_i32_0 : i32, i32
  }
  func.func @transform_2(%arg0: i32) -> (i32, i32) {
    %c0_i32 = arith.constant 0 : i32
    %c0_i32_0 = arith.constant 0 : i32
    %c0_i32_1 = arith.constant 0 : i32
    return %c0_i32, %c0_i32_0 : i32, i32
  }
  func.func @transform_3(%arg0: i32) -> (i32, i32) {
    %c0_i32 = arith.constant 0 : i32
    %c0_i32_0 = arith.constant 0 : i32
    return %arg0, %c0_i32 : i32, i32
  }
}

</mosaic_0001>

<bundles_post_ra>
// kernel: tpu_custom_call.1
= control target key start
LH: loop header
LB: loop body
LE: loop exit
PB: predicated region body
PF: predicated region fallthrough
CT: control target
= control target key end

     0   :  { %v192_v0 = vmov 0.0   ;;  %vm54_vm0 = vcmask 1041408   ;;  %vm193_vm1 = vmmov 0   ;;  %vm38_vm2 = vcmask 31744   ;;  %s292_s1 = inlined_call_operand.vmem [shape: f32[4,8], index: 1, kind: input, shape index: {}]   ;;  %s293_s0 = inlined_call_operand.vmem [shape: f32[68,4], index: 0, kind: input, shape index: {}]   ;;  %s294_s2 = inlined_call_operand.vmem [shape: f32[1,8], index: 2, kind: input, shape index: {}]   ;;  %s295_s3 = inlined_call_operand.vmem [shape: f32[68,8], index: 3, kind: output, shape index: {}]  }
   0x1   :  { %166 = vmatprep.subr.bf16.mxu0 %v192_v0  ;;  %v29_v1 = vld [vmem:[%s292_s1] sm:$0xf]  ;;  %168 = vmatprep.mubr.msk.bf16.mxu0 %vm193_vm1, %v192_v0  ;;  %v16_v3 = vld [vmem:[%s293_s0 + $0x8] sm:$0xff]  ;;  %v21_v5 = vld [vmem:[%s293_s0 + $0x30] sm:$0xff]  ;;  %vm139_vm3 = vcmask 64512   ;;  %vm148_vm4 = vcmask 60416  }
   0x2   :  { %v15_v2 = vld [vmem:[%s293_s0] sm:$0xff]  ;;  %v30_v4 = vpack.c.bf16 %v29_v1, %v29_v1  ;;  %188 = vmatprep.subr.bf16.mxu1 %v192_v0  ;;  %180 = vmatprep.mubr.msk.bf16.mxu1 %vm193_vm1, %v192_v0  ;;  %v22_v6 = vld [vmem:[%s293_s0 + $0x38] sm:$0xff]  ;;  %v17_v10 = vld [vmem:[%s293_s0 + $0x10] sm:$0xff] }
   0x3   :  { %v24_v8 = vpack.c.bf16 %v16_v3, %v15_v2  ;;  %v27_v9 = vpack.c.bf16 %v22_v6, %v21_v5  ;;  %v18_v11 = vld [vmem:[%s293_s0 + $0x18] sm:$0xff]  ;;  %v23_v12 = vld [vmem:[%s293_s0 + $0x40] sm:$0xf]  ;;  %v20_v16 = vld [vmem:[%s293_s0 + $0x28] sm:$0xff] }
   0x4   :  { %v56_v7 = vsel %vm54_vm0, %v30_v4, 0  ;;  %v25_v13 = vpack.c.bf16 %v18_v11, %v17_v10  ;;  %v28_v14 = vpack.c.bf16 %v23_v12, %v23_v12  ;;  %v19_v15 = vld [vmem:[%s293_s0 + $0x20] sm:$0xff] }
   0x5   :  { %167 = vmatpush3.bf16.msra.mxu0 %v56_v7  ;;  %189 = vmatpush3.bf16.msra.mxu1 %v56_v7  ;;  %v26_v17 = vpack.c.bf16 %v20_v16, %v19_v15  ;;  %v154_v18 = vld [vmem:[%s294_s2] ss:$0 sm:$0xff] }
   0x8   :  { %169 = vmatmul.mubr.msk.bf16.vlgmr.msra.gmra.mxu0 %vm38_vm2, %v24_v8  ;;  %181 = vmatmul.mubr.msk.bf16.vlgmr.msra.gmra.mxu1 %vm38_vm2, %v27_v9 }
   0x9   :  { %172 = vmatprep.mubr.msk.bf16.mxu0 %vm193_vm1, %v192_v0  ;;  %184 = vmatprep.mubr.msk.bf16.mxu1 %vm193_vm1, %v192_v0 }
  0x10   :  { %173 = vmatmul.mubr.msk.bf16.gmra.mxu0 %vm38_vm2, %v25_v13  ;;  %185 = vmatmul.mubr.msk.bf16.gmra.mxu1 %vm38_vm2, %v28_v14 }
  0x11   :  { %176 = vmatprep.mubr.msk.bf16.mxu0 %vm193_vm1, %v192_v0 }
  0x18   :  { %177 = vmatmul.mubr.msk.bf16.gmra.mxu0 %vm38_vm2, %v26_v17 }
  0xc8   :  { %v92_v19 = vpop.f32.mrf.mxu0  ;;  %v116_v20 = vpop.f32.mrf.mxu1 }
  0xc9   :  { %v93_v21 = vadd.f32 %v154_v18, %v92_v19  ;;  %v117_v22 = vadd.f32 %v154_v18, %v116_v20 }
  0xca   :  { %v170_v23 = vpop.f32.mrf.mxu0  ;;  %v182_v24 = vpop.f32.mrf.mxu1 }
  0xcb   :  { %v130_v25 = vmax.f32 %v93_v21, 0.0  ;;  %v136_v26 = vmax.f32 %v117_v22, 0.0 }
  0xcc   :  { %v95_v27 = vpop.f32.mrf.mxu0  ;;  %v119_v28 = vpop.f32.mrf.mxu1 }
  0xcd   :  { %140 = vst.msk [vmem:[%s295_s3] sm:$0xff] %vm139_vm3, %v130_v25  ;;  %v96_v29 = vadd.f32 %v154_v18, %v95_v27  ;;  %146 = vst.msk [vmem:[%s295_s3 + $0x30] sm:$0xff] %vm139_vm3, %v136_v26  ;;  %v120_v30 = vadd.f32 %v154_v18, %v119_v28 }
  0xce   :  { %v171_v31 = vpop.f32.mrf.mxu0  ;;  %v183_v32 = vpop.f32.mrf.mxu1 }
  0xcf   :  { %v131_v33 = vmax.f32 %v96_v29, 0.0  ;;  %v137_v34 = vmax.f32 %v120_v30, 0.0 }
  0xd0   :  { %v100_v35 = vpop.f32.mrf.mxu0  ;;  %v124_v36 = vpop.f32.mrf.mxu1 }
  0xd1   :  { %141 = vst.msk [vmem:[%s295_s3 + $0x8] sm:$0xff] %vm139_vm3, %v131_v33  ;;  %v101_v37 = vadd.f32 %v154_v18, %v100_v35  ;;  %147 = vst.msk [vmem:[%s295_s3 + $0x38] sm:$0xff] %vm139_vm3, %v137_v34  ;;  %v125_v38 = vadd.f32 %v154_v18, %v124_v36 }
  0xd2   :  { %v174_v39 = vpop.f32.mrf.mxu0  ;;  %v186_v40 = vpop.f32.mrf.mxu1 }
  0xd3   :  { %v132_v41 = vmax.f32 %v101_v37, 0.0  ;;  %v138_v42 = vmax.f32 %v125_v38, 0.0 }
  0xd4   :  { %v103_v43 = vpop.f32.mrf.mxu0  ;;  %v127_v44 = vpop.f32.mrf.mxu1 }
  0xd5   :  { %142 = vst.msk [vmem:[%s295_s3 + $0x10] sm:$0xff] %vm139_vm3, %v132_v41  ;;  %v104_v45 = vadd.f32 %v154_v18, %v103_v43 }
  0xd6   :  { %149 = vst.msk [vmem:[%s295_s3 + $0x40] sm:$0xf] %vm148_vm4, %v138_v42  ;;  %v175_v46 = vpop.f32.mrf.mxu0  ;;  %v187_v47 = vpop.f32.mrf.mxu1 }
  0xd7   :  { %v133_v48 = vmax.f32 %v104_v45, 0.0 }
  0xd8   :  { %v108_v49 = vpop.f32.mrf.mxu0 }
  0xd9   :  { %143 = vst.msk [vmem:[%s295_s3 + $0x18] sm:$0xff] %vm139_vm3, %v133_v48  ;;  %v109_v50 = vadd.f32 %v154_v18, %v108_v49 }
  0xda   :  { %v178_v51 = vpop.f32.mrf.mxu0 }
  0xdb   :  { %v134_v52 = vmax.f32 %v109_v50, 0.0 }
  0xdc   :  { %v111_v53 = vpop.f32.mrf.mxu0 }
  0xdd   :  { %144 = vst.msk [vmem:[%s295_s3 + $0x20] sm:$0xff] %vm139_vm3, %v134_v52  ;;  %v112_v54 = vadd.f32 %v154_v18, %v111_v53 }
  0xde   :  { %v179_v55 = vpop.f32.mrf.mxu0 }
  0xdf   :  { %v135_v56 = vmax.f32 %v112_v54, 0.0 }
  0xe1   :  { %145 = vst.msk [vmem:[%s295_s3 + $0x28] sm:$0xff] %vm139_vm3, %v135_v56 }

</bundles_post_ra>
